<compile_context>
chip_gen: v7x
topology: tpu7x:2x2x1
jax: 0.10.0
libtpu: 0.0.40
codegen_flags: <defaults>
</compile_context>

<pallas_src>
import math

import jax
import jax.numpy as jnp
from jax.experimental import pallas as pl
from jax.experimental.pallas import tpu as pltpu


def mlp_cos_kernel(x_ref, t_ref, v0_ref, w1x_ref, w1t_ref, w1v_ref, b1_ref,
                   w5_ref, b5_ref, o_ref):
    # matmul1 on the MXU: bf16 inputs (x already bf16), f32 accumulation, K=256.
    h = jnp.dot(x_ref[...], w1x_ref[...], preferred_element_type=jnp.float32)
    # The t / v0 columns of the original (258,256) weight become rank-1
    # broadcast-FMAs on the VPU (f32), plus the bias.
    h = h + t_ref[...] * w1t_ref[...] + v0_ref[...] * w1v_ref[...] + b1_ref[...]
    h = jnp.cos(h)
    # matmul2 into a narrow (TM, 8) head: bf16 inputs, f32 accumulation.
    o = jnp.dot(h.astype(jnp.bfloat16), w5_ref[...],
                preferred_element_type=jnp.float32)
    o_ref[...] = (o + b5_ref[...]).astype(o_ref.dtype)


def _round_up(n, m):
    return ((n + m - 1) // m) * m


_ALIGN = 16  # bf16 sublane packing: tiled blocks use multiples of 16 rows


def _choose_tm(B, block_rows, min_steps=2):
    """Pick the batch tile size.

    The tile is a multiple of 16 rows (bf16 packing) OR the full batch (full
    extent blocks are exempt from alignment).  No batch padding is performed —
    Pallas masks the ragged last tile.  For medium/large batches we keep at
    least `min_steps` grid steps so the 'parallel' batch axis shards across
    TensorCores (v7x megacore) and input/output DMAs can pipeline.
    """
    if B <= _ALIGN * min_steps:
        return B                                    # tiny batch: one full block
    if B % _ALIGN != 0 and B <= block_rows:
        return B                                    # full-extent block, no pad
    tm = min(block_rows, _round_up(pl.cdiv(B, min_steps), _ALIGN))
    return max(tm, _ALIGN)


def mlp_cos_forward(x, t, v0, w1, b1, w5, b5, *, block_rows=1024):
    """Forward pass of MLP_COS.

    x: (B,256), t: (B,1), v0: (B,1)
    w1: (258,256) = linear1.weight.T, b1: (1,256)
    w5: (256,2)   = linear5.weight.T, b5: (1,2)
    """
    B, D = x.shape          # D = 256
    H = w1.shape[1]         # 256 hidden
    N = w5.shape[1]         # 2 outputs
    NP = 8                  # narrow padded output head (contiguous 32 B/row)

    # x goes to the MXU in bf16 anyway — feed it as bf16 to halve its HBM
    # traffic.  (Biggest win when the upstream producer already emits bf16;
    # a standalone cast here still costs one extra f32 read of x.)
    if x.dtype != jnp.bfloat16:
        x = x.astype(jnp.bfloat16)
    t = t.astype(jnp.float32)
    v0 = v0.astype(jnp.float32)

    # Split W1: MXU part for x, rank-1 rows for the concatenated t / v0 columns.
    w1 = w1.astype(jnp.float32)
    w1x = w1[:D, :].astype(jnp.bfloat16)      # (256, 256) bf16 for the MXU
    w1t = w1[D:D + 1, :]                      # (1, 256) f32
    w1v = w1[D + 1:D + 2, :]                  # (1, 256) f32
    b1 = b1.reshape(1, H).astype(jnp.float32)

    # Zero-pad the 2-wide output head to 8 columns (full-extent last dim).
    w5p = jnp.zeros((H, NP), jnp.bfloat16).at[:, :N].set(w5.astype(jnp.bfloat16))
    b5p = jnp.zeros((1, NP), jnp.float32).at[:, :N].set(
        b5.reshape(1, N).astype(jnp.float32))

    TM = _choose_tm(B, block_rows)
    grid = (pl.cdiv(B, TM),)   # ragged last tile is masked by Pallas — no pad

    def row_spec(cols):
        return pl.BlockSpec((TM, cols), lambda i: (i, 0))

    def resident(shape):  # weights/biases: same block every step -> stay in VMEM
        return pl.BlockSpec(shape, lambda i: (0, 0))

    cost = pl.CostEstimate(
        flops=2 * B * (D * H + H * NP) + 5 * B * H,
        transcendentals=B * H,
        bytes_accessed=(B * D * 2               # x (bf16)
                        + B * 2 * 4             # t, v0 (f32)
                        + B * NP * 4            # narrow f32 output
                        + D * H * 2             # w1x bf16
                        + 3 * H * 4             # w1t, w1v, b1
                        + H * NP * 2            # w5 padded bf16
                        + NP * 4),              # b5 padded
    )

    out = pl.pallas_call(
        mlp_cos_kernel,
        out_shape=jax.ShapeDtypeStruct((B, NP), jnp.float32),
        grid=grid,
        in_specs=[
            row_spec(D),          # x tile        (TM, 256) bf16
            row_spec(1),          # t tile        (TM, 1)
            row_spec(1),          # v0 tile       (TM, 1)
            resident((D, H)),     # w1x (bf16)    (256, 256)
            resident((1, H)),     # w1t           (1, 256)
            resident((1, H)),     # w1v           (1, 256)
            resident((1, H)),     # b1            (1, 256)
            resident((H, NP)),    # w5 padded     (256, 8) bf16
            resident((1, NP)),    # b5 padded     (1, 8)
        ],
        out_specs=row_spec(NP),   # (TM, 8) output tile
        compiler_params=pltpu.CompilerParams(
            dimension_semantics=("parallel",),
            vmem_limit_bytes=32 * 1024 * 1024,  # explicit (v5e default is 16 MiB)
        ),
        cost_estimate=cost,
    )(x, t, v0, w1x, w1t, w1v, b1, w5p, b5p)

    return out[:, :N]


def kaiming_uniform_tanh(key, shape):
    # PyTorch kaiming_uniform_ with mode='fan_in', nonlinearity='tanh':
    # gain = 5/3, bound = gain * sqrt(3 / fan_in); shape is (in, out) so fan_in = shape[0].
    fan_in = shape[0]
    gain = 5.0 / 3.0
    bound = gain * math.sqrt(3.0 / fan_in)
    return jax.random.uniform(key, shape, minval=-bound, maxval=bound,
                              dtype=jnp.float32)


def reference_forward(x, t, v0, w1, b1, w5, b5):
    # Exact f32 reference of the PyTorch module.
    xc = jnp.concatenate([x, t, v0], axis=1)
    h = jnp.cos(xc @ w1 + b1)
    return h @ w5 + b5


def reference_forward_bf16(x, t, v0, w1, b1, w5, b5):
    # Same arithmetic the kernel performs (bf16 MXU inputs, f32 accumulation,
    # t/v0 columns as rank-1 f32 updates) — used for a tight correctness check.
    D = x.shape[1]
    h = jnp.dot(x.astype(jnp.bfloat16), w1[:D].astype(jnp.bfloat16),
                preferred_element_type=jnp.float32)
    h = h + t * w1[D:D + 1] + v0 * w1[D + 1:D + 2] + b1
    h = jnp.cos(h)
    o = jnp.dot(h.astype(jnp.bfloat16), w5.astype(jnp.bfloat16),
                preferred_element_type=jnp.float32)
    return o + b5


if __name__ == "__main__":
    key = jax.random.PRNGKey(0)
    k_x, k_t, k_v, k_w1, k_w5 = jax.random.split(key, 5)

    B = 8
    x = jax.random.normal(k_x, (B, 256), dtype=jnp.float32)
    t = jax.random.normal(k_t, (B, 1), dtype=jnp.float32)
    v0 = jax.random.normal(k_v, (B, 1), dtype=jnp.float32)

    # Parameters (deterministic init matching the module's weights_init)
    w1 = kaiming_uniform_tanh(k_w1, (258, 256))          # linear1.weight^T
    b1 = jnp.full((1, 256), 0.001, dtype=jnp.float32)    # linear1.bias
    w5 = kaiming_uniform_tanh(k_w5, (256, 2))            # linear5.weight^T
    b5 = jnp.full((1, 2), 0.001, dtype=jnp.float32)      # linear5.bias

    out = jax.block_until_ready(mlp_cos_forward(x, t, v0, w1, b1, w5, b5))
    assert out.shape == (B, 2)

    # Tight check vs a reference using the kernel's precision (bf16 MXU, f32 acc)
    ref_bf16 = reference_forward_bf16(x, t, v0, w1, b1, w5, b5)
    assert jnp.allclose(out, ref_bf16, atol=2e-3, rtol=2e-3)

    # Loose check vs the exact f32 module (bf16 matmul inputs => relaxed tol)
    ref_f32 = reference_forward(x, t, v0, w1, b1, w5, b5)
    assert jnp.allclose(out, ref_f32, atol=1e-1, rtol=1e-1)

    print("KERNEL_OK")
</pallas_src>

<mosaic_0001>
module attributes {stable_mosaic.version = 11 : i64} {
  func.func @mlp_cos_kernel(%arg0: i32, %arg1: memref<8x256xbf16, #tpu.memory_space<vmem>>, %arg2: memref<8x1xf32, #tpu.memory_space<vmem>>, %arg3: memref<8x1xf32, #tpu.memory_space<vmem>>, %arg4: memref<256x256xbf16, #tpu.memory_space<vmem>>, %arg5: memref<1x256xf32, #tpu.memory_space<vmem>>, %arg6: memref<1x256xf32, #tpu.memory_space<vmem>>, %arg7: memref<1x256xf32, #tpu.memory_space<vmem>>, %arg8: memref<256x8xbf16, #tpu.memory_space<vmem>>, %arg9: memref<1x8xf32, #tpu.memory_space<vmem>>, %arg10: memref<8x8xf32, #tpu.memory_space<vmem>>) attributes {dimension_semantics = [#tpu.dimension_semantics<parallel>], iteration_bounds = array<i64: 1>, scalar_prefetch = 0 : i64, scratch_operands = 0 : i64, tpu.core_type = #tpu.core_type<tc>, window_params = [{transform_indices = @transform_0, window_bounds = array<i64: 8, 256>}, {transform_indices = @transform_1, window_bounds = array<i64: 8, 1>}, {transform_indices = @transform_2, window_bounds = array<i64: 8, 1>}, {pipeline_mode = #tpu.pipeline_mode<synchronous>, transform_indices = @transform_3, window_bounds = array<i64: 256, 256>}, {pipeline_mode = #tpu.pipeline_mode<synchronous>, transform_indices = @transform_4, window_bounds = array<i64: 1, 256>}, {pipeline_mode = #tpu.pipeline_mode<synchronous>, transform_indices = @transform_5, window_bounds = array<i64: 1, 256>}, {pipeline_mode = #tpu.pipeline_mode<synchronous>, transform_indices = @transform_6, window_bounds = array<i64: 1, 256>}, {pipeline_mode = #tpu.pipeline_mode<synchronous>, transform_indices = @transform_7, window_bounds = array<i64: 256, 8>}, {pipeline_mode = #tpu.pipeline_mode<synchronous>, transform_indices = @transform_8, window_bounds = array<i64: 1, 8>}, {transform_indices = @transform_9, window_bounds = array<i64: 8, 8>}]} {
    %c0 = arith.constant 0 : index
    %c0_0 = arith.constant 0 : index
    %0 = vector.load %arg1[%c0, %c0_0] : memref<8x256xbf16, #tpu.memory_space<vmem>>, vector<8x256xbf16>
    %c0_1 = arith.constant 0 : index
    %c0_2 = arith.constant 0 : index
    %1 = vector.load %arg4[%c0_1, %c0_2] : memref<256x256xbf16, #tpu.memory_space<vmem>>, vector<256x256xbf16>
    %cst = arith.constant dense<0.000000e+00> : vector<8x256xf32>
    %2 = tpu.matmul %0, %1, %cst {dimension_numbers = #tpu.dot_dimension_numbers<[1], [0], [0], [1], [0, 0, 1, 1], [], []>} : vector<8x256xbf16>, vector<256x256xbf16>, vector<8x256xf32> -> vector<8x256xf32>
    %c0_3 = arith.constant 0 : index
    %c0_4 = arith.constant 0 : index
    %3 = vector.load %arg2[%c0_3, %c0_4] : memref<8x1xf32, #tpu.memory_space<vmem>>, vector<8x1xf32>
    %c0_5 = arith.constant 0 : index
    %c0_6 = arith.constant 0 : index
    %4 = vector.load %arg5[%c0_5, %c0_6] : memref<1x256xf32, #tpu.memory_space<vmem>>, vector<1x256xf32>
    %5 = vector.broadcast %3 : vector<8x1xf32> to vector<8x256xf32>
    %6 = vector.broadcast %4 : vector<1x256xf32> to vector<8x256xf32>
    %7 = arith.mulf %5, %6 : vector<8x256xf32>
    %8 = arith.addf %2, %7 : vector<8x256xf32>
    %c0_7 = arith.constant 0 : index
    %c0_8 = arith.constant 0 : index
    %9 = vector.load %arg3[%c0_7, %c0_8] : memref<8x1xf32, #tpu.memory_space<vmem>>, vector<8x1xf32>
    %c0_9 = arith.constant 0 : index
    %c0_10 = arith.constant 0 : index
    %10 = vector.load %arg6[%c0_9, %c0_10] : memref<1x256xf32, #tpu.memory_space<vmem>>, vector<1x256xf32>
    %11 = vector.broadcast %9 : vector<8x1xf32> to vector<8x256xf32>
    %12 = vector.broadcast %10 : vector<1x256xf32> to vector<8x256xf32>
    %13 = arith.mulf %11, %12 : vector<8x256xf32>
    %14 = arith.addf %8, %13 : vector<8x256xf32>
    %c0_11 = arith.constant 0 : index
    %c0_12 = arith.constant 0 : index
    %15 = vector.load %arg7[%c0_11, %c0_12] : memref<1x256xf32, #tpu.memory_space<vmem>>, vector<1x256xf32>
    %16 = vector.broadcast %15 : vector<1x256xf32> to vector<8x256xf32>
    %17 = arith.addf %14, %16 : vector<8x256xf32>
    %18 = math.cos %17 : vector<8x256xf32>
    %19 = arith.truncf %18 : vector<8x256xf32> to vector<8x256xbf16>
    %c0_13 = arith.constant 0 : index
    %c0_14 = arith.constant 0 : index
    %20 = vector.load %arg8[%c0_13, %c0_14] : memref<256x8xbf16, #tpu.memory_space<vmem>>, vector<256x8xbf16>
    %cst_15 = arith.constant dense<0.000000e+00> : vector<8x8xf32>
    %21 = tpu.matmul %19, %20, %cst_15 {dimension_numbers = #tpu.dot_dimension_numbers<[1], [0], [0], [1], [0, 0, 1, 1], [], []>} : vector<8x256xbf16>, vector<256x8xbf16>, vector<8x8xf32> -> vector<8x8xf32>
    %c0_16 = arith.constant 0 : index
    %c0_17 = arith.constant 0 : index
    %22 = vector.load %arg9[%c0_16, %c0_17] : memref<1x8xf32, #tpu.memory_space<vmem>>, vector<1x8xf32>
    %23 = vector.broadcast %22 : vector<1x8xf32> to vector<8x8xf32>
    %24 = arith.addf %21, %23 : vector<8x8xf32>
    %c0_18 = arith.constant 0 : index
    %c0_19 = arith.constant 0 : index
    %25 = vector.load %arg10[%c0_18, %c0_19] : memref<8x8xf32, #tpu.memory_space<vmem>>, vector<8x8xf32>
    tpu.vector_store %arg10[%c0_18, %c0_19], %24 {strides = array<i32>} : memref<8x8xf32, #tpu.memory_space<vmem>>, vector<8x8xf32>,
    return
  }
  func.func @transform_0(%arg0: i32) -> (i32, i32) {
    %c0_i32 = arith.constant 0 : i32
    %c0_i32_0 = arith.constant 0 : i32
    return %arg0, %c0_i32 : i32, i32
  }
  func.func @transform_1(%arg0: i32) -> (i32, i32) {
    %c0_i32 = arith.constant 0 : i32
    %c0_i32_0 = arith.constant 0 : i32
    return %arg0, %c0_i32 : i32, i32
  }
  func.func @transform_2(%arg0: i32) -> (i32, i32) {
    %c0_i32 = arith.constant 0 : i32
    %c0_i32_0 = arith.constant 0 : i32
    return %arg0, %c0_i32 : i32, i32
  }
  func.func @transform_3(%arg0: i32) -> (i32, i32) {
    %c0_i32 = arith.constant 0 : i32
    %c0_i32_0 = arith.constant 0 : i32
    %c0_i32_1 = arith.constant 0 : i32
    return %c0_i32, %c0_i32_0 : i32, i32
  }
  func.func @transform_4(%arg0: i32) -> (i32, i32) {
    %c0_i32 = arith.constant 0 : i32
    %c0_i32_0 = arith.constant 0 : i32
    %c0_i32_1 = arith.constant 0 : i32
    return %c0_i32, %c0_i32_0 : i32, i32
  }
  func.func @transform_5(%arg0: i32) -> (i32, i32) {
    %c0_i32 = arith.constant 0 : i32
    %c0_i32_0 = arith.constant 0 : i32
    %c0_i32_1 = arith.constant 0 : i32
    return %c0_i32, %c0_i32_0 : i32, i32
  }
  func.func @transform_6(%arg0: i32) -> (i32, i32) {
    %c0_i32 = arith.constant 0 : i32
    %c0_i32_0 = arith.constant 0 : i32
    %c0_i32_1 = arith.constant 0 : i32
    return %c0_i32, %c0_i32_0 : i32, i32
  }
  func.func @transform_7(%arg0: i32) -> (i32, i32) {
    %c0_i32 = arith.constant 0 : i32
    %c0_i32_0 = arith.constant 0 : i32
    %c0_i32_1 = arith.constant 0 : i32
    return %c0_i32, %c0_i32_0 : i32, i32
  }
  func.func @transform_8(%arg0: i32) -> (i32, i32) {
    %c0_i32 = arith.constant 0 : i32
    %c0_i32_0 = arith.constant 0 : i32
    %c0_i32_1 = arith.constant 0 : i32
    return %c0_i32, %c0_i32_0 : i32, i32
  }
  func.func @transform_9(%arg0: i32) -> (i32, i32) {
    %c0_i32 = arith.constant 0 : i32
    %c0_i32_0 = arith.constant 0 : i32
    return %arg0, %c0_i32 : i32, i32
  }
}

</mosaic_0001>

<bundles_post_ra>
// kernel: tpu_custom_call.1
= control target key start
LH: loop header
LB: loop body
LE: loop exit
PB: predicated region body
PF: predicated region fallthrough
CT: control target
= control target key end

     0   :  { %14 = vsyncpa [#allocation3], 0  ;;  %s1216_s0 = inlined_call_operand.vmem [shape: bf16[8,256], index: 0, kind: input, shape index: {}]   ;;  %s1217_s1 = inlined_call_operand.vmem [shape: f32[8,1], index: 1, kind: input, shape index: {}]   ;;  %s1218_s2 = inlined_call_operand.vmem [shape: f32[8,1], index: 2, kind: input, shape index: {}]   ;;  %s1219_s3 = inlined_call_operand.hbm [shape: bf16[256,256], index: 3, kind: input, shape index: {}]   ;;  %s1220_s4 = inlined_call_operand.vmem [shape: f32[1,256], index: 4, kind: input, shape index: {}]   ;;  %s1221_s5 = inlined_call_operand.vmem [shape: f32[1,256], index: 5, kind: input, shape index: {}]   ;;  %s1222_s6 = inlined_call_operand.vmem [shape: f32[1,256], index: 6, kind: input, shape index: {}]   ;;  %s1223_s7 = inlined_call_operand.vmem [shape: bf16[256,8], index: 7, kind: input, shape index: {}]   ;;  %s1224_s8 = inlined_call_operand.vmem [shape: f32[1,8], index: 8, kind: input, shape index: {}]   ;;  %s1225_s9 = inlined_call_operand.hbm [shape: f32[8,8], index: 9, kind: output, shape index: {}]  }
   0x1   :  { %15 = vsyncpa [#allocation4], 0  ;;  %s968_s30 = smov [#allocation2]   ;;  %s920_s13 = scalar_lea.hbm %s1219_s3, 4096 }
   0x2   :  { %s27_s10 = sshll.u32 %s968_s30, 4  ;;  %p921_p0 = scmp.ne.s32.totalorder %s1219_s3, %s920_s13  ;;  %s28_s10 = int_to_ptr.vmem [resolvable:$true] %s27_s10 }
   0x3   :  { %p924_p1 = scmp.lt.u32.totalorder %s920_s13, %s1219_s3 }
   0x5   :  { %p926_p2 = pnand %p924_p1, %p921_p0 }
   0x7   :  { %929 = shalt.err (!%p926_p2)
}
   0x8   :  { %s930_s18 = scalar_lea.vmem %s28_s10, 4096  ;;  %p935_p4 = scmp.lt.s32.totalorder %s28_s10, %s28_s10 }
   0x9   :  { %p931_p3 = scmp.ne.s32.totalorder %s28_s10, %s930_s18  ;;  %p936_p5 = scmp.lt.s32.totalorder %s930_s18, %s930_s18 }
   0xb   :  { %p937_p6 = por %p936_p5, %p935_p4 }
   0xd   :  { %p938_p7 = pnand %p937_p6, %p931_p3 }
   0xf   :  { %941 = shalt.err (!%p938_p7)
}
  0x10   :  { %s969_s19 = smov 128   ;;  %s970_s20 = smov 8  }
  0x11   :  { %33 = dma.hbm_to_vmem [thread:$0]  %s1219_s3, 4096, %s28_s10, [#allocation3], %s969_s19, %s969_s19, %s970_s20  }
  0x12   :  { %964 = dma.done.wait [#allocation3], 4096  }
  0x13   :  { %965 = vsyncadd [#allocation3], 4294963200  ;;  %v971_v0 = vmov 0   ;;  %v846_v1 = vld [vmem:[#allocation2 + $0x4] ss:$8 sps:$4 sm:$0xff]   ;;  %v900_v42 = vld [vmem:[%s1223_s7 + $0x50] sm:$0xff]   ;;  %v89_v54 = vlaneseq }
  0x14   :  { %845 = vset.pattern.permute.xlu0 %v971_v0  ;;  %v848_v2 = vld [vmem:[#allocation2] ss:$8 sps:$4 sm:$0xff]   ;;  %268 = vmatprep.subr.bf16.mxu0 %v846_v1  ;;  %v849_v3 = vld [vmem:[#allocation2 + $0x14] ss:$8 sps:$4 sm:$0xff]   ;;  %v851_v4 = vld [vmem:[#allocation2 + $0x10] ss:$8 sps:$4 sm:$0xff]  }
  0x15   :  { %269 = vmatpush1.bf16.msra.mxu0 %v848_v2  ;;  %v852_v5 = vld [vmem:[#allocation2 + $0x24] ss:$8 sps:$4 sm:$0xff]   ;;  %v854_v6 = vld [vmem:[#allocation2 + $0x20] ss:$8 sps:$4 sm:$0xff]   ;;  %v855_v7 = vld [vmem:[#allocation2 + $0x34] ss:$8 sps:$4 sm:$0xff]  }
  0x16   :  { %270 = vmatprep.subr.bf16.mxu0 %v849_v3  ;;  %v857_v8 = vld [vmem:[#allocation2 + $0x30] ss:$8 sps:$4 sm:$0xff]   ;;  %v858_v9 = vld [vmem:[#allocation2 + $0x44] ss:$8 sps:$4 sm:$0xff]   ;;  %v860_v10 = vld [vmem:[#allocation2 + $0x40] ss:$8 sps:$4 sm:$0xff]  }
  0x17   :  { %v861_v11 = vld [vmem:[#allocation2 + $0x54] ss:$8 sps:$4 sm:$0xff]   ;;  %v863_v12 = vld [vmem:[#allocation2 + $0x50] ss:$8 sps:$4 sm:$0xff]   ;;  %v864_v13 = vld [vmem:[#allocation2 + $0x64] ss:$8 sps:$4 sm:$0xff]  }
  0x18   :  { %v48_v14 = vld [vmem:[%s1216_s0] sm:$0xff]  ;;  %v867_v17 = vld [vmem:[#allocation2 + $0x74] ss:$8 sps:$4 sm:$0xff]   ;;  %v869_v20 = vld [vmem:[#allocation2 + $0x70] ss:$8 sps:$4 sm:$0xff]   ;;  %v90_v55 = vshrl.u32 %v89_v54, 7 }
  0x19   :  { %271 = vmatpush1.bf16.msra.mxu0 %v851_v4  ;;  %v81_v15 = vld [vmem:[%s1217_s1] sm:$0xff]  ;;  %v746_v18 = vcombine.high %v48_v14, %v48_v14  ;;  %v873_v23 = vld [vmem:[#allocation2 + $0x94] ss:$8 sps:$4 sm:$0xff]   ;;  %v875_v24 = vld [vmem:[#allocation2 + $0x90] ss:$8 sps:$4 sm:$0xff]   ;;  %v745_v37 = vcombine.low %v48_v14, %v48_v14 }
  0x1a   :  { %272 = vmatprep.subr.bf16.mxu0 %v852_v5  ;;  %v866_v16 = vld [vmem:[#allocation2 + $0x60] ss:$8 sps:$4 sm:$0xff]   ;;  %85 = vperm.xlu0 %845, %v81_v15   ;;  %v870_v21 = vld [vmem:[#allocation2 + $0x84] ss:$8 sps:$4 sm:$0xff]   ;;  %v879_v27 = vld [vmem:[#allocation2 + $0xb4] ss:$8 sps:$4 sm:$0xff]  }
  0x1b   :  { %v309_v19 = vld [vmem:[%s1218_s2] sm:$0xff]  ;;  %300 = vmatprep.mubr.bf16.mxu0 %v746_v18  ;;  %v881_v28 = vld [vmem:[#allocation2 + $0xb0] ss:$8 sps:$4 sm:$0xff]   ;;  %v885_v31 = vld [vmem:[#allocation2 + $0xd4] ss:$8 sps:$4 sm:$0xff]   ;;  %v91_v56 = vsub.s32 0, %v90_v55 }
  0x1c   :  { %v872_v22 = vld [vmem:[#allocation2 + $0x80] ss:$8 sps:$4 sm:$0xff]   ;;  %v876_v25 = vld [vmem:[#allocation2 + $0xa4] ss:$8 sps:$4 sm:$0xff]   ;;  %v887_v32 = vld [vmem:[#allocation2 + $0xd0] ss:$8 sps:$4 sm:$0xff]  }
  0x1d   :  { %273 = vmatpush1.bf16.msra.mxu0 %v854_v6  ;;  %v878_v26 = vld [vmem:[#allocation2 + $0xa0] ss:$8 sps:$4 sm:$0xff]   ;;  %v882_v29 = vld [vmem:[#allocation2 + $0xc4] ss:$8 sps:$4 sm:$0xff]   ;;  %v891_v35 = vld [vmem:[#allocation2 + $0xf4] ss:$8 sps:$4 sm:$0xff]  }
  0x1e   :  { %274 = vmatprep.subr.bf16.mxu0 %v855_v7  ;;  %313 = vperm.xlu0 %845, %v309_v19   ;;  %v884_v30 = vld [vmem:[#allocation2 + $0xc0] ss:$8 sps:$4 sm:$0xff]   ;;  %v888_v33 = vld [vmem:[#allocation2 + $0xe4] ss:$8 sps:$4 sm:$0xff]   ;;  %v893_v36 = vld [vmem:[#allocation2 + $0xf0] ss:$8 sps:$4 sm:$0xff]  }
  0x1f   :  { %v890_v34 = vld [vmem:[#allocation2 + $0xe0] ss:$8 sps:$4 sm:$0xff]   ;;  %v901_v43 = vld [vmem:[%s1223_s7 + $0x10] sm:$0xff]   ;;  %v902_v44 = vld [vmem:[%s1223_s7 + $0x58] sm:$0xff]   ;;  %v95_v58 = vsub.s32 1, %v90_v55 }
  0x20   :  { %v896_v38 = vld [vmem:[%s1223_s7 + $0x40] sm:$0xff]   ;;  %v898_v40 = vld [vmem:[%s1223_s7 + $0x48] sm:$0xff]   ;;  %v903_v45 = vld [vmem:[%s1223_s7 + $0x18] sm:$0xff]   ;;  %v977_v54 = vmov 2131351028  }
  0x21   :  { %275 = vmatpush1.bf16.msra.mxu0 %v857_v8  ;;  %v897_v39 = vld [vmem:[%s1223_s7] sm:$0xff]   ;;  %804 = vmatprep.subr.bf16.mxu1 %v896_v38  ;;  %v899_v41 = vld [vmem:[%s1223_s7 + $0x8] sm:$0xff]   ;;  %v908_v50 = vld [vmem:[%s1223_s7 + $0x70] sm:$0xff]  }
  0x22   :  { %276 = vmatprep.subr.bf16.mxu0 %v858_v9  ;;  %805 = vmatpush3.bf16.msra.mxu1 %v897_v39  ;;  %v904_v46 = vld [vmem:[%s1223_s7 + $0x60] sm:$0xff]   ;;  %v906_v48 = vld [vmem:[%s1223_s7 + $0x68] sm:$0xff]   ;;  %v909_v51 = vld [vmem:[%s1223_s7 + $0x30] sm:$0xff]  }
  0x23   :  { %806 = vmatprep.subr.bf16.mxu1 %v898_v40  ;;  %v905_v47 = vld [vmem:[%s1223_s7 + $0x20] sm:$0xff]   ;;  %v907_v49 = vld [vmem:[%s1223_s7 + $0x28] sm:$0xff]   ;;  %v910_v52 = vld [vmem:[%s1223_s7 + $0x78] sm:$0xff]  }
  0x24   :  { %v911_v53 = vld [vmem:[%s1223_s7 + $0x38] sm:$0xff]   ;;  %v82_v57 = vld [vmem:[%s1220_s4] sm:$0x3] }
  0x25   :  { %277 = vmatpush1.bf16.msra.mxu0 %v860_v10  ;;  %v92_v60 = vrot.slane %v82_v57, %v91_v56  ;;  %v310_v61 = vld [vmem:[%s1221_s5] sm:$0x3]  ;;  %v96_v62 = vrot.slane %v82_v57, %v95_v58 }
  0x26   :  { %278 = vmatprep.subr.bf16.mxu0 %v861_v11  ;;  %807 = vmatpush3.bf16.msra.mxu1 %v899_v41  ;;  %v320_v0 = vrot.slane %v310_v61, %v91_v56  ;;  %v324_v1 = vrot.slane %v310_v61, %v95_v58  ;;  %v331_v3 = vld [vmem:[%s1222_s6] sm:$0x3]  ;;  %s978_s6 = smov [#allocation5]  }
  0x27   :  { %808 = vmatprep.subr.bf16.mxu1 %v900_v42  ;;  %v336_v8 = vrot.slane %v331_v3, %v91_v56  ;;  %v972_v42 = vmov 2102212464   ;;  %s736_s16 = sshll.u32 %s978_s6, 4  ;;  %s737_s16 = int_to_ptr.vmem [resolvable:$true] %s736_s16 }
  0x28   :  { %s942_s17 = scalar_lea.vmem %s737_s16, 128  ;;  %p947_p9 = scmp.lt.s32.totalorder %s737_s16, %s737_s16 }
  0x29   :  { %279 = vmatpush1.bf16.msra.mxu0 %v863_v12  ;;  %v340_v12 = vrot.slane %v331_v3, %v95_v58  ;;  %p943_p8 = scmp.ne.s32.totalorder %s737_s16, %s942_s17  ;;  %p948_p10 = scmp.lt.s32.totalorder %s942_s17, %s942_s17 }
  0x2a   :  { %280 = vmatprep.subr.bf16.mxu0 %v864_v13  ;;  %809 = vmatpush3.bf16.msra.mxu1 %v901_v43 }
  0x2b   :  { %810 = vmatprep.subr.bf16.mxu1 %v902_v44  ;;  %v973_v44 = vmov 920167782   ;;  %p949_p11 = por %p948_p10, %p947_p9 }
  0x2d   :  { %281 = vmatpush1.bf16.msra.mxu0 %v866_v16  ;;  %p950_p12 = pnand %p949_p11, %p943_p8 }
  0x2e   :  { %282 = vmatprep.subr.bf16.mxu0 %v867_v17  ;;  %811 = vmatpush3.bf16.msra.mxu1 %v903_v45 }
  0x2f   :  { %812 = vmatprep.subr.bf16.mxu1 %v904_v46 }
  0x31   :  { %283 = vmatpush1.bf16.msra.mxu0 %v869_v20 }
  0x32   :  { %284 = vmatprep.subr.bf16.mxu0 %v870_v21  ;;  %813 = vmatpush3.bf16.msra.mxu1 %v905_v47  ;;  %v974_v47 = vmov 683565275  }
  0x33   :  { %814 = vmatprep.subr.bf16.mxu1 %v906_v48 }
  0x35   :  { %285 = vmatpush1.bf16.msra.mxu0 %v872_v22 }
  0x36   :  { %286 = vmatprep.subr.bf16.mxu0 %v873_v23  ;;  %815 = vmatpush3.bf16.msra.mxu1 %v907_v49 }
  0x37   :  { %816 = vmatprep.subr.bf16.mxu1 %v908_v50  ;;  %v975_v50 = vmov 1326507024  }
  0x39   :  { %287 = vmatpush1.bf16.msra.mxu0 %v875_v24 }
  0x3a   :  { %288 = vmatprep.subr.bf16.mxu0 %v876_v25  ;;  %817 = vmatpush3.bf16.msra.mxu1 %v909_v51 }
  0x3b   :  { %818 = vmatprep.subr.bf16.mxu1 %v910_v52  ;;  %v976_v52 = vmov 2475754826  }
  0x3d   :  { %289 = vmatpush1.bf16.msra.mxu0 %v878_v26 }
  0x3e   :  { %290 = vmatprep.subr.bf16.mxu0 %v879_v27  ;;  %819 = vmatpush3.bf16.msra.mxu1 %v911_v53 }
  0x41   :  { %291 = vmatpush1.bf16.msra.mxu0 %v881_v28 }
  0x42   :  { %292 = vmatprep.subr.bf16.mxu0 %v882_v29 }
  0x45   :  { %293 = vmatpush1.bf16.msra.mxu0 %v884_v30 }
  0x46   :  { %294 = vmatprep.subr.bf16.mxu0 %v885_v31 }
  0x49   :  { %295 = vmatpush1.bf16.msra.mxu0 %v887_v32 }
  0x4a   :  { %296 = vmatprep.subr.bf16.mxu0 %v888_v33 }
  0x4d   :  { %297 = vmatpush1.bf16.msra.mxu0 %v890_v34 }
  0x4e   :  { %298 = vmatprep.subr.bf16.mxu0 %v891_v35 }
  0x51   :  { %299 = vmatpush1.bf16.msra.mxu0 %v893_v36 }
  0x54   :  { %301 = vmatmul.mubr.bf16.vlgmr.msra.gmra.mrb[0].mxu0 %v745_v37 }
  0x99   :  { %v86_v59 = vpop.permute.xlu0 %85 }
  0x9a   :  { %v99_v63 = vmul.f32 %v92_v60, %v86_v59  ;;  %v100_v4 = vmul.f32 %v96_v62, %v86_v59 }
  0x9d   :  { %v314_v2 = vpop.permute.xlu0 %313 }
  0x9e   :  { %v327_v6 = vmul.f32 %v320_v0, %v314_v2  ;;  %v328_v10 = vmul.f32 %v324_v1, %v314_v2 }
 0x127   :  { %v302_v5 = vpop.f32.mrb[0].mxu0 }
 0x128   :  { %v303_v7 = vadd.f32 %v302_v5, %v99_v63  ;;  %v304_v9 = vpop.f32.mrb[1].mxu0 }
 0x129   :  { %v305_v11 = vadd.f32 %v304_v9, %v100_v4  ;;  %v306_v13 = vpop.f32.mrb[2].mxu0 }
 0x12a   :  { %v329_v14 = vadd.f32 %v327_v6, %v303_v7  ;;  %v307_v15 = vpop.f32.mrb[3].mxu0 }
 0x12b   :  { %v330_v16 = vadd.f32 %v328_v10, %v305_v11 }
 0x12c   :  { %v1107_v17 = vadd.f32 %v336_v8, %v329_v14 }
 0x12d   :  { %v1109_v18 = vadd.f32 %v340_v12, %v330_v16 }
 0x12e   :  { %v348_v19 = vand.u32 2139095040, %v1107_v17  ;;  %v345_v20 = vand.u32 2147483647, %v1107_v17 }
 0x12f   :  { %v451_v21 = vand.u32 2139095040, %v1109_v18  ;;  %v448_v22 = vand.u32 2147483647, %v1109_v18  ;;  %vm450_vm14 = vcmp.lt.s32.totalorder %v1109_v18, 0 }
 0x130   :  { %v349_v23 = vshrl.u32 %v348_v19, 23  ;;  %v352_v25 = vand.u32 8388607, %v345_v20 }
 0x131   :  { %v452_v24 = vshrl.u32 %v451_v21, 23  ;;  %v455_v27 = vand.u32 8388607, %v448_v22  ;;  %vm1178_vm15 = vcmp.le.f32.partialorder %v448_v22, 0.7853982 }
 0x132   :  { %v779_v26 = vadd.s32 4294967169, %v349_v23  ;;  %v353_v31 = vor.u32 8388608, %v352_v25 }
 0x133   :  { %v783_v28 = vadd.s32 4294967169, %v452_v24  ;;  %v456_v32 = vor.u32 8388608, %v455_v27 }
 0x134   :  { %v355_v29 = vadd.s32 1, %v779_v26  ;;  %v1121_v37 = vshll.u32 %v353_v31, 8 }
 0x135   :  { %v458_v30 = vadd.s32 1, %v783_v28  ;;  %v1126_v41 = vshll.u32 %v456_v32, 8 }
 0x136   :  { %vm356_vm0 = vcmp.gt.s32.totalorder %v355_v29, 0 }
 0x137   :  { %v357_v33 = vsel %vm356_vm0, %v355_v29, 0  ;;  %vm459_vm1 = vcmp.gt.s32.totalorder %v458_v30, 0  ;;  %vm347_vm0 = vcmp.lt.s32.totalorder %v1107_v17, 0 }
 0x138   :  { %v1119_v34 = vand.u32 31, %v357_v33  ;;  %v460_v35 = vsel %vm459_vm1, %v458_v30, 0  ;;  %v1123_v38 = vshrl.u32 %v357_v33, 5  ;;  %vm1190_vm1 = vcmp.le.f32.partialorder %v345_v20, 0.7853982 }
 0x139   :  { %v462_v36 = vand.u32 31, %v460_v35  ;;  %v461_v40 = vshrl.u32 %v460_v35, 5 }
 0x13a   :  { %v360_v39 = vsub.s32 32, %v1119_v34  ;;  %v371_v43 = vshll.u32 %v972_v42, %v1119_v34  ;;  %v374_v45 = vshll.u32 %v973_v44, %v1119_v34  ;;  %vm380_vm3 = vcmp.lt.s32.totalorder %v1123_v38, 4 }
 0x13b   :  { %v463_v46 = vsub.s32 32, %v462_v36  ;;  %v465_v48 = vshll.u32 %v974_v47, %v462_v36  ;;  %v468_v53 = vshll.u32 %v976_v52, %v462_v36  ;;  %v471_v55 = vshll.u32 %v977_v54, %v462_v36 }
 0x13c   :  { %v372_v49 = vshrl.u32 %v973_v44, %v360_v39  ;;  %v375_v51 = vshrl.u32 %v975_v50, %v360_v39  ;;  %v474_v59 = vshll.u32 %v972_v42, %v462_v36  ;;  %v477_v62 = vshll.u32 %v973_v44, %v462_v36 }
 0x13d   :  { %v466_v56 = vshrl.u32 %v976_v52, %v463_v46  ;;  %v469_v57 = vshrl.u32 %v977_v54, %v463_v46  ;;  %v472_v58 = vshrl.u32 %v972_v42, %v463_v46  ;;  %v464_v60 = vshrl.u32 %v974_v47, %v463_v46 }
 0x13e   :  { %v475_v61 = vshrl.u32 %v973_v44, %v463_v46  ;;  %v478_v63 = vshrl.u32 %v975_v50, %v463_v46  ;;  %v373_v0 = vor.u32 %v372_v49, %v371_v43  ;;  %v376_v4 = vor.u32 %v375_v51, %v374_v45 }
 0x13f   :  { %v467_v1 = vor.u32 %v466_v56, %v465_v48  ;;  %v470_v2 = vor.u32 %v469_v57, %v468_v53  ;;  %v473_v3 = vor.u32 %v472_v58, %v471_v55  ;;  %vm480_vm2 = vcmp.lt.s32.totalorder %v461_v40, 1 }
 0x140   :  { %v476_v5 = vor.u32 %v475_v61, %v474_v59  ;;  %v479_v6 = vor.u32 %v478_v63, %v477_v62  ;;  %vm482_vm4 = vcmp.lt.s32.totalorder %v461_v40, 3  ;;  %vm483_vm5 = vcmp.lt.s32.totalorder %v461_v40, 4 }
 0x141   :  { %v484_v7 = vsel %vm480_vm2, %v464_v60, %v467_v1  ;;  %v485_v8 = vsel %vm483_vm5, %v473_v3, 2102212464  ;;  %v488_v9 = vsel %vm480_vm2, %v467_v1, %v470_v2  ;;  %v492_v11 = vsel %vm480_vm2, %v470_v2, %v473_v3 }
 0x142   :  { %v489_v10 = vsel %vm483_vm5, %v476_v5, 920167782  ;;  %vm481_vm6 = vcmp.lt.s32.totalorder %v461_v40, 2  ;;  %v486_v12 = vsel %vm482_vm4, %v470_v2, %v485_v8  ;;  %v493_v14 = vsel %vm483_vm5, %v479_v6, 1326507024 }
 0x143   :  { %v490_v13 = vsel %vm482_vm4, %v473_v3, %v489_v10  ;;  %v386_v15 = vsel %vm380_vm3, %v373_v0, 920167782  ;;  %v390_v16 = vsel %vm380_vm3, %v376_v4, 1326507024  ;;  %v494_v21 = vsel %vm482_vm4, %v476_v5, %v493_v14 }
 0x144   :  { %v491_v19 = vsel %vm481_vm6, %v488_v9, %v490_v13  ;;  %v487_v23 = vsel %vm481_vm6, %v484_v7, %v486_v12  ;;  %v495_v24 = vsel %vm481_vm6, %v492_v11, %v494_v21  ;;  %v362_v29 = vshll.u32 %v974_v47, %v1119_v34 }
 0x145   :  { %v1136_v25 = vmul.u32.u64.low %v1126_v41, %v491_v19  ;;  %v1137_v26 = vmul.u32.u64.high %v1126_v41, %v491_v19, %v1136_v25  ;;  %v1140_v27 = vmul.u32.u64.low %v1126_v41, %v495_v24  ;;  %v1141_v28 = vmul.u32.u64.high %v1126_v41, %v495_v24, %v1140_v27 }
 0x146   :  { %v363_v30 = vshrl.u32 %v976_v52, %v360_v39  ;;  %v365_v31 = vshll.u32 %v976_v52, %v1119_v34  ;;  %v366_v32 = vshrl.u32 %v977_v54, %v360_v39  ;;  %v368_v33 = vshll.u32 %v977_v54, %v1119_v34 }
 0x147   :  { %v369_v35 = vshrl.u32 %v972_v42, %v360_v39  ;;  %v503_v36 = vmul.u32 %v1126_v41, %v487_v23  ;;  %v361_v40 = vshrl.u32 %v974_v47, %v360_v39  ;;  %vm377_vm7 = vcmp.lt.s32.totalorder %v1123_v38, 1 }
 0x148   :  { %v364_v43 = vor.u32 %v363_v30, %v362_v29  ;;  %v506_v44 = vadd.s32 1, %v1137_v26  ;;  %v367_v45 = vor.u32 %v366_v32, %v365_v31  ;;  %vm379_vm8 = vcmp.lt.s32.totalorder %v1123_v38, 3 }
 0x149   :  { %v370_v46 = vor.u32 %v369_v35, %v368_v33  ;;  %vm505_vm9 = vc.u32 %v1141_v28, %v1136_v25  ;;  %vm378_vm10 = vcmp.lt.s32.totalorder %v1123_v38, 2  ;;  %v391_v42 = vsel %vm379_vm8, %v373_v0, %v390_v16 }
 0x14a   :  { %v381_v34 = vsel %vm377_vm7, %v361_v40, %v364_v43  ;;  %v507_v41 = vsel %vm505_vm9, %v506_v44, %v1137_v26  ;;  %v385_v47 = vsel %vm377_vm7, %v364_v43, %v367_v45  ;;  %v504_v12 = vadd.s32 %v1136_v25, %v1141_v28 }
 0x14b   :  { %v382_v39 = vsel %vm380_vm3, %v370_v46, 2102212464  ;;  %v387_v48 = vsel %vm379_vm8, %v370_v46, %v386_v15  ;;  %v508_v49 = vadd.s32 %v507_v41, %v503_v36  ;;  %v389_v52 = vsel %vm377_vm7, %v367_v45, %v370_v46 }
 0x14c   :  { %v383_v50 = vsel %vm379_vm8, %v367_v45, %v382_v39  ;;  %v388_v51 = vsel %vm378_vm10, %v385_v47, %v387_v48  ;;  %v392_v53 = vsel %vm378_vm10, %v389_v52, %v391_v42  ;;  %vm540_vm5 = vweird.f32 %v1109_v18 }
 0x14d   :  { %v1162_v54 = vmul.u32.u64.low %v1121_v37, %v388_v51  ;;  %v1163_v55 = vmul.u32.u64.high %v1121_v37, %v388_v51, %v1162_v54  ;;  %v509_v56 = vadd.s32 536870912, %v508_v49  ;;  %v384_v59 = vsel %vm378_vm10, %v381_v34, %v383_v50 }
 0x14e   :  { %v1166_v57 = vmul.u32.u64.low %v1121_v37, %v392_v53  ;;  %v1167_v58 = vmul.u32.u64.high %v1121_v37, %v392_v53, %v1166_v57  ;;  %v400_v63 = vmul.u32 %v1121_v37, %v384_v59  ;;  %vm437_vm9 = vweird.f32 %v1107_v17 }
 0x14f   :  { %v510_v60 = vshrl.u32 %v509_v56, 30  ;;  %v403_v61 = vadd.s32 1, %v1163_v55  ;;  %vm728_vm10 = vcmask 64512  }
 0x150   :  { %vm402_vm11 = vc.u32 %v1167_v58, %v1162_v54  ;;  %v401_v32 = vadd.s32 %v1162_v54, %v1167_v58 }
 0x151   :  { %v511_v62 = vshll.u32 %v510_v60, 30  ;;  %v404_v38 = vsel %vm402_vm11, %v403_v61, %v1163_v55  ;;  %v534_v42 = vsub.s32 4, %v510_v60 }
 0x152   :  { %v405_v1 = vadd.s32 %v404_v38, %v400_v63 }
 0x153   :  { %v512_v0 = vsub.s32 %v508_v49, %v511_v62  ;;  %v535_v49 = vsel %vm450_vm14, %v534_v42, %v510_v60 }
 0x154   :  { %v406_v3 = vadd.s32 536870912, %v405_v1  ;;  %v537_v51 = vsel %vm1178_vm15, 0, %v535_v49 }
 0x155   :  { %v514_v2 = vsub.s32 0, %v512_v0  ;;  %v541_v55 = vand.u32 3, %v537_v51 }
 0x156   :  { %v407_v5 = vshrl.u32 %v406_v3, 30 }
 0x157   :  { %v784_v4 = vmin.u32 %v514_v2, %v512_v0  ;;  %vm546_vm2 = vcmp.eq.s32.totalorder %v541_v55, 2  ;;  %vm543_vm3 = vcmp.eq.s32.totalorder %v541_v55, 0  ;;  %vm542_vm4 = vcmp.lt.s32.totalorder %v541_v55, 2 }
 0x158   :  { %v408_v7 = vshll.u32 %v407_v5, 30  ;;  %v431_v54 = vsub.s32 4, %v407_v5 }
 0x159   :  { %v516_v6 = vclz %v784_v4 }
 0x15a   :  { %v409_v9 = vsub.s32 %v405_v1, %v408_v7  ;;  %v432_v60 = vsel %vm347_vm0, %v431_v54, %v407_v5 }
 0x15b   :  { %v785_v8 = vadd.s32 4294967294, %v516_v6  ;;  %v434_v63 = vsel %vm1190_vm1, 0, %v432_v60 }
 0x15c   :  { %v411_v11 = vsub.s32 0, %v409_v9  ;;  %v438_v2 = vand.u32 3, %v434_v63 }
 0x15d   :  { %vm786_vm12 = vcmp.lt.s32.totalorder %v785_v8, 0 }
 0x15e   :  { %v519_v10 = vsel %vm786_vm12, 0, %v785_v8  ;;  %v780_v14 = vmin.u32 %v411_v11, %v409_v9  ;;  %vm443_vm6 = vcmp.eq.s32.totalorder %v438_v2, 2  ;;  %vm440_vm7 = vcmp.eq.s32.totalorder %v438_v2, 0 }
 0x15f   :  { %v520_v37 = vsub.s32 32, %v519_v10  ;;  %v524_v13 = vsub.s32 4294967266, %v519_v10  ;;  %v521_v15 = vshll.u32 %v512_v0, %v519_v10  ;;  %vm439_vm8 = vcmp.lt.s32.totalorder %v438_v2, 2 }
 0x160   :  { %v413_v21 = vclz %v780_v14 }
 0x161   :  { %v522_v16 = vshrl.u32 %v504_v12, %v520_v37  ;;  %v525_v19 = vadd.s32 127, %v524_v13  ;;  %v787_v12 = vld [vmem:[%s1224_s8] ss:$0 sm:$0xff] }
 0x162   :  { %v781_v26 = vadd.s32 4294967294, %v413_v21 }
 0x163   :  { %v523_v23 = vor.u32 %v522_v16, %v521_v15  ;;  %v526_v24 = vshll.u32 %v525_v19, 23 }
 0x164   :  { %vm782_vm13 = vcmp.lt.s32.totalorder %v781_v26, 0 }
 0x165   :  { %v527_v27 = vor.u32 4788187, %v526_v24  ;;  %v530_v30 = vcvt.s32.f32 %v523_v23  ;;  %v416_v31 = vsel %vm782_vm13, 0, %v781_v26 }
 0x166   :  { %v417_v33 = vsub.s32 32, %v416_v31  ;;  %v421_v35 = vsub.s32 4294967266, %v416_v31  ;;  %v418_v28 = vshll.u32 %v409_v9, %v416_v31 }
 0x167   :  { %v528_v29 = vand.u32 2147483647, %v527_v27 }
 0x168   :  { %v419_v36 = vshrl.u32 %v401_v32, %v417_v33  ;;  %v422_v40 = vadd.s32 127, %v421_v35 }
 0x169   :  { %v531_v25 = vmul.f32 %v530_v30, %v528_v29 }
 0x16a   :  { %v420_v44 = vor.u32 %v419_v36, %v418_v28  ;;  %v423_v45 = vshll.u32 %v422_v40, 23 }
 0x16b   :  { %v532_v43 = vxor.u32 2147483648, %v531_v25 }
 0x16c   :  { %v424_v39 = vor.u32 4788187, %v423_v45  ;;  %v427_v48 = vcvt.s32.f32 %v420_v44 }
 0x16d   :  { %v533_v34 = vsel %vm450_vm14, %v532_v43, %v531_v25 }
 0x16e   :  { %v536_v41 = vsel %vm1178_vm15, %v1109_v18, %v533_v34  ;;  %v425_v47 = vand.u32 2147483647, %v424_v39 }
 0x16f   :  { %912 = vcosq.f32 %v536_v41 }
 0x170   :  { %914 = vsinq.f32 %v536_v41  ;;  %v428_v50 = vmul.f32 %v427_v48, %v425_v47 }
 0x172   :  { %v429_v22 = vxor.u32 2147483648, %v428_v50 }
 0x174   :  { %v430_v53 = vsel %vm347_vm0, %v429_v22, %v428_v50 }
 0x175   :  { %v433_v56 = vsel %vm1190_vm1, %v1107_v17, %v430_v53 }
 0x176   :  { %916 = vcosq.f32 %v433_v56 }
 0x177   :  { %918 = vsinq.f32 %v433_v56 }
 0x179   :  { %v913_v57 = vpop.eup %912 }
 0x17a   :  { %v915_v58 = vpop.eup %914  ;;  %v547_v59 = vxor.u32 2147483648, %v913_v57 }
 0x17b   :  { %v544_v61 = vxor.u32 2147483648, %v915_v58 }
 0x17c   :  { %v548_v20 = vsel %vm546_vm2, %v547_v59, %v915_v58 }
 0x17d   :  { %v545_v62 = vsel %vm543_vm3, %v913_v57, %v544_v61 }
 0x17e   :  { %v549_v38 = vsel %vm542_vm4, %v545_v62, %v548_v20 }
 0x17f   :  { %v550_v0 = vsel %vm540_vm5, nan, %v549_v38 }
 0x180   :  { %v552_v1 = vpack.c.bf16 %v550_v0, %v550_v0  ;;  %v917_v3 = vpop.eup %916 }
 0x181   :  { %v919_v4 = vpop.eup %918  ;;  %v444_v6 = vxor.u32 2147483648, %v917_v3 }
 0x182   :  { %720 = vmatprep.mubr.bf16.mxu1 %v552_v1  ;;  %v441_v5 = vxor.u32 2147483648, %v919_v4 }
 0x183   :  { %v445_v7 = vsel %vm443_vm6, %v444_v6, %v919_v4 }
 0x184   :  { %v442_v8 = vsel %vm440_vm7, %v917_v3, %v441_v5 }
 0x185   :  { %v446_v9 = vsel %vm439_vm8, %v442_v8, %v445_v7 }
 0x186   :  { %v447_v10 = vsel %vm437_vm9, nan, %v446_v9 }
 0x187   :  { %v551_v11 = vpack.c.bf16 %v447_v10, %v447_v10 }
 0x189   :  { %721 = vmatmul.mubr.bf16.vlgmr.msra.gmra.mrb[0].mxu1 %v551_v11 }
 0x25c   :  { %v820_v18 = vpop.f32.mrb[0].mxu1 }
 0x25d   :  { %v821_v37 = vpop.f32.mrb[1].mxu1 }
 0x25e   :  { %v822_v13 = vadd.f32 %v821_v37, %v820_v18  ;;  %v823_v14 = vpop.f32.mrb[2].mxu1 }
 0x25f   :  { %v824_v15 = vpop.f32.mrb[3].mxu1 }
 0x260   :  { %v723_v16 = vadd.f32 %v822_v13, %v787_v12 }
 0x262   :  { %729 = vst.msk [vmem:[#allocation5] sm:$0xff] %vm728_vm10, %v723_v16 }
 0x263   :  { %953 = shalt.err (!%p950_p12)
}
 0x264   :  { %s954_s8 = scalar_lea.hbm %s1225_s9, 128 }
 0x265   :  { %p955_p13 = scmp.ne.s32.totalorder %s1225_s9, %s954_s8  ;;  %p958_p0 = scmp.lt.u32.totalorder %s954_s8, %s1225_s9 }
 0x267   :  { %p960_p1 = pnand %p958_p0, %p955_p13 }
 0x269   :  { %963 = shalt.err (!%p960_p1)
}
 0x26a   :  { %739 = dma.vmem_to_hbm [thread:$0]  %s737_s16, 128, %s1225_s9, [#allocation4]  }
 0x26b   :  { %966 = dma.done.wait [#allocation4], 128  }
 0x26c   :  { %967 = vsyncadd [#allocation4], 4294967168 }
 0x26d   :  { %743 = vsyncpa [#allocation3], 1 }
 0x26e   :  { %744 = vsyncpa [#allocation4], 1 }

</bundles_post_ra>
